<compile_context>
chip_gen: v5e
topology: v5e:2x2
jax: 0.10.0
libtpu: 0.0.40
codegen_flags: <defaults>
</compile_context>

<pallas_src>
import functools

import jax
import jax.numpy as jnp
from jax.experimental import pallas as pl
from jax.experimental.pallas import tpu as pltpu


# ----------------------------------------------------------------------------
# Pallas kernel: one tiny one-hot matmul, one dense full-block store.
# ----------------------------------------------------------------------------
def _unpool_kernel(x_ref, sc_ref, o_ref):
    # x_ref:  (tm, W)        input rows (N*C*H folded into the row dim)
    # sc_ref: (W, s*Wo)      constant one-hot column-scatter matrix
    # o_ref:  (tm, s*Wo)     output rows; reshapes contiguously to (N,C,Ho,Wo)
    o_ref[...] = jnp.dot(
        x_ref[...],
        sc_ref[...],
        precision=jax.lax.Precision.HIGHEST,   # keep the copy exact
        preferred_element_type=jnp.float32,
    ).astype(o_ref.dtype)


def _col_scatter_matrix(W, stride, dtype):
    """Sc[w, u] = 1 iff u == w*stride, shape (W, stride*W*stride).

    The width is stride*Wo (not Wo) so that the (stride-1) zero rows that
    follow each stuffed output row are produced by the same matmul and land
    contiguously in memory (row-major), i.e. the row stuffing is free.
    """
    Wo = W * stride
    src = jnp.arange(W)[:, None] * stride                  # (W, 1)
    return (src == jnp.arange(stride * Wo)[None, :]).astype(dtype)


def unpool(x, stride=2):
    """x: (N, C, H, W) -> (N, C, H*stride, W*stride), zero-stuffed."""
    N, C, H, W = x.shape
    Ho, Wo = H * stride, W * stride
    M = N * C * H                                # matmul rows
    row_w = stride * Wo                          # output row width per input row

    x2d = x.reshape(M, W)                        # contiguous -> free reshape
    sc = _col_scatter_matrix(W, stride, x.dtype)

    # Single block at small/typical shapes; tile rows only when large.
    tm = M if M <= 1024 else 1024
    grid = (pl.cdiv(M, tm),)

    itemsize = jnp.dtype(x.dtype).itemsize
    cost = pl.CostEstimate(
        flops=2 * M * W * row_w,
        transcendentals=0,
        bytes_accessed=(M * W + W * row_w + M * row_w) * itemsize,
    )

    out2d = pl.pallas_call(
        _unpool_kernel,
        out_shape=jax.ShapeDtypeStruct((M, row_w), x.dtype),
        grid=grid,
        in_specs=[
            pl.BlockSpec((tm, W), lambda i: (i, 0)),
            pl.BlockSpec((W, row_w), lambda i: (0, 0)),    # tiny shared constant
        ],
        out_specs=pl.BlockSpec((tm, row_w), lambda i: (i, 0)),
        compiler_params=pltpu.CompilerParams(
            dimension_semantics=("parallel",)),
        cost_estimate=cost,
    )(x2d, sc)

    return out2d.reshape(N, C, Ho, Wo)           # contiguous -> free reshape


# ----------------------------------------------------------------------------
# Pure-JAX reference mirroring torch.nn.functional.conv_transpose2d semantics
# ----------------------------------------------------------------------------
def ref_unpool(x, stride=2):
    N, C, H, W = x.shape
    y = jnp.zeros((N, C, H, stride, W, stride), x.dtype)
    y = y.at[:, :, :, 0, :, 0].set(x)
    return y.reshape(N, C, H * stride, W * stride)


# ----------------------------------------------------------------------------
if __name__ == "__main__":
    key = jax.random.PRNGKey(0)
    N, C, H, W = 2, 4, 16, 16                    # Unpool(num_channels=4, stride=2)
    stride = 2
    x = jax.random.normal(key, (N, C, H, W), jnp.float32)

    run = jax.jit(functools.partial(unpool, stride=stride))
    out = jax.block_until_ready(run(x))
    ref = jax.block_until_ready(ref_unpool(x, stride))

    assert out.shape == (N, C, H * stride, W * stride), out.shape
    assert bool(jnp.all(jnp.isfinite(out)))
    if bool(jnp.allclose(out, ref, atol=1e-5, rtol=1e-5)):
        print("KERNEL_OK")
    else:
        err = float(jnp.max(jnp.abs(out - ref)))
        print(f"MISMATCH max_abs_err={err}")
</pallas_src>

<mosaic_0001>
module attributes {stable_mosaic.version = 11 : i64} {
  func.func @_unpool_kernel(%arg0: i32, %arg1: memref<128x16xf32, #tpu.memory_space<vmem>>, %arg2: memref<16x64xf32, #tpu.memory_space<vmem>>, %arg3: memref<128x64xf32, #tpu.memory_space<vmem>>) attributes {dimension_semantics = [#tpu.dimension_semantics<parallel>], iteration_bounds = array<i64: 1>, scalar_prefetch = 0 : i64, scratch_operands = 0 : i64, tpu.core_type = #tpu.core_type<tc>, window_params = [{transform_indices = @transform_0, window_bounds = array<i64: 128, 16>}, {pipeline_mode = #tpu.pipeline_mode<synchronous>, transform_indices = @transform_1, window_bounds = array<i64: 16, 64>}, {transform_indices = @transform_2, window_bounds = array<i64: 128, 64>}]} {
    %c0 = arith.constant 0 : index
    %c0_0 = arith.constant 0 : index
    %0 = vector.load %arg1[%c0, %c0_0] : memref<128x16xf32, #tpu.memory_space<vmem>>, vector<128x16xf32>
    %c0_1 = arith.constant 0 : index
    %c0_2 = arith.constant 0 : index
    %1 = vector.load %arg2[%c0_1, %c0_2] : memref<16x64xf32, #tpu.memory_space<vmem>>, vector<16x64xf32>
    %cst = arith.constant dense<0.000000e+00> : vector<128x64xf32>
    %2 = tpu.matmul %0, %1, %cst {dimension_numbers = #tpu.dot_dimension_numbers<[1], [0], [0], [1], [0, 0, 1, 1], [], []>, precision = #tpu.contract_precision<fp32>} : vector<128x16xf32>, vector<16x64xf32>, vector<128x64xf32> -> vector<128x64xf32>
    %c0_3 = arith.constant 0 : index
    %c0_4 = arith.constant 0 : index
    %3 = vector.load %arg3[%c0_3, %c0_4] : memref<128x64xf32, #tpu.memory_space<vmem>>, vector<128x64xf32>
    tpu.vector_store %arg3[%c0_3, %c0_4], %2 {strides = array<i32>} : memref<128x64xf32, #tpu.memory_space<vmem>>, vector<128x64xf32>,
    return
  }
  func.func @transform_0(%arg0: i32) -> (i32, i32) {
    %c0_i32 = arith.constant 0 : i32
    %c0_i32_0 = arith.constant 0 : i32
    return %arg0, %c0_i32 : i32, i32
  }
  func.func @transform_1(%arg0: i32) -> (i32, i32) {
    %c0_i32 = arith.constant 0 : i32
    %c0_i32_0 = arith.constant 0 : i32
    %c0_i32_1 = arith.constant 0 : i32
    return %c0_i32, %c0_i32_0 : i32, i32
  }
  func.func @transform_2(%arg0: i32) -> (i32, i32) {
    %c0_i32 = arith.constant 0 : i32
    %c0_i32_0 = arith.constant 0 : i32
    return %arg0, %c0_i32 : i32, i32
  }
}

</mosaic_0001>

<bundles_post_ra>
// kernel: unpool.1
= control target key start
LH: loop header
LB: loop body
LE: loop exit
PB: predicated region body
PF: predicated region fallthrough
CT: control target
= control target key end

     0   :  { %7 = vsyncpa [#allocation3], 0  ;;  %s773_s12 = smov [#allocation2]   ;;  %s774_s14 = smov 128   ;;  %s1182_s0 = inlined_call_operand.hbm [shape: f32[128,16], index: 0, kind: input, shape index: {}]   ;;  %s1183_s1 = inlined_call_operand.vmem [shape: f32[16,64], index: 1, kind: input, shape index: {}]   ;;  %s1184_s2 = inlined_call_operand.vmem [shape: f32[128,64], index: 2, kind: output, shape index: {}]  }
   0x1   :  { %s12_s11 = sshll.u32 %s1182_s0, 4  ;;  %s14_s13 = sshll.u32 %s773_s12, 4  ;;  %s13_s11 = int_to_ptr.hbm [resolvable:$true] %s12_s11  ;;  %s15_s13 = int_to_ptr.vmem [resolvable:$true] %s14_s13 }
   0x2   :  { %s775_s15 = smov 8  }
   0x3   :  { %20 = dma.hbm_to_vmem [thread:$0]  %s13_s11, 2048, %s15_s13, [#allocation3], %s774_s14, %s774_s14, %s775_s15  }
   0x4   :  { %771 = dma.done.wait [#allocation3], 2048  }
   0x5   :  { %772 = vsyncadd [#allocation3], 4294965248  ;;  %vm45_vm0 = vcmask 130048   ;;  %v44_v0 = vld [vmem:[%s1183_s1 + $0x8] sm:$0xff]  ;;  %v43_v1 = vld [vmem:[%s1183_s1] sm:$0xff]  ;;  %vm718_vm1 = vcmask 523264  }
   0x6   :  { %v35_v2 = vld [vmem:[#allocation2 + $0x40] sm:$0xff]  ;;  %v800_v3 = vand.u32 4294901760, %v44_v0  ;;  %v802_v4 = vand.u32 4294901760, %v43_v1  ;;  %v36_v6 = vld [vmem:[#allocation2 + $0x48] sm:$0xff]  ;;  %v37_v8 = vld [vmem:[#allocation2 + $0x50] sm:$0xff] }
   0x7   :  { %v71_v5 = vsel %vm45_vm0, %v35_v2, 0  ;;  %v27_v7 = vld [vmem:[#allocation2] sm:$0xff]  ;;  %v74_v10 = vsel %vm45_vm0, %v36_v6, 0  ;;  %v28_v12 = vld [vmem:[#allocation2 + $0x8] sm:$0xff]  ;;  %v77_v18 = vsel %vm45_vm0, %v37_v8, 0  ;;  %v29_v33 = vld [vmem:[#allocation2 + $0x10] sm:$0xff] }
   0x8   :  { %v805_v9 = vand.u32 4294901760, %v71_v5  ;;  %v47_v11 = vsel %vm45_vm0, %v27_v7, 0  ;;  %740 = vmatpush.msra.mxu2 %v800_v3  ;;  %v256_v13 = vsub.f32 %v44_v0, %v800_v3  ;;  %v262_v14 = vsub.f32 %v43_v1, %v802_v4  ;;  %109 = vmatpush.msra.mxu0 %v800_v3  ;;  %v38_v39 = vld [vmem:[#allocation2 + $0x58] sm:$0xff]  ;;  %v39_v55 = vld [vmem:[#allocation2 + $0x60] sm:$0xff] }
   0x9   :  { %v813_v15 = vand.u32 4294901760, %v74_v10  ;;  %v815_v16 = vand.u32 4294901760, %v47_v11  ;;  %v50_v19 = vsel %vm45_vm0, %v28_v12, 0  ;;  %v838_v31 = vand.u32 4294901760, %v77_v18  ;;  %v30_v45 = vld [vmem:[#allocation2 + $0x18] sm:$0xff]  ;;  %v31_v59 = vld [vmem:[#allocation2 + $0x20] sm:$0xff] }
   0xa   :  { %v818_v17 = vsub.f32 %v71_v5, %v805_v9  ;;  %741 = vmatpush.msra.mxu2 %v802_v4  ;;  %v257_v20 = vand.u32 4294901760, %v256_v13  ;;  %v263_v21 = vand.u32 4294901760, %v262_v14  ;;  %111 = vmatpush.msra.mxu0 %v802_v4  ;;  %v831_v25 = vand.u32 4294901760, %v50_v19  ;;  %v40_v5 = vld [vmem:[#allocation2 + $0x68] sm:$0xff] }
   0xb   :  { %v824_v22 = vsub.f32 %v74_v10, %v813_v15  ;;  %v828_v23 = vsub.f32 %v47_v11, %v815_v16  ;;  %v53_v41 = vsel %vm45_vm0, %v29_v33, 0  ;;  %v852_v43 = vsub.f32 %v77_v18, %v838_v31  ;;  %v32_v10 = vld [vmem:[#allocation2 + $0x28] sm:$0xff] }
   0xc   :  { %v178_v24 = vand.u32 4294901760, %v818_v17  ;;  %348 = vmatpush.msrb.mxu2 %v256_v13  ;;  %v258_v26 = vsub.f32 %v256_v13, %v257_v20  ;;  %v264_v27 = vsub.f32 %v262_v14, %v263_v21  ;;  %565 = vmatpush.msrb.mxu0 %v257_v20  ;;  %v841_v32 = vsub.f32 %v50_v19, %v831_v25 }
   0xd   :  { %v114_v28 = vand.u32 4294901760, %v828_v23  ;;  %v186_v30 = vand.u32 4294901760, %v824_v22  ;;  %v854_v44 = vand.u32 4294901760, %v53_v41  ;;  %v80_v46 = vsel %vm45_vm0, %v38_v39, 0 }
   0xe   :  { %v179_v29 = vsub.f32 %v818_v17, %v178_v24  ;;  %351 = vmatpush.msrb.mxu2 %v262_v14  ;;  %v259_v34 = vand.u32 4294901760, %v258_v26  ;;  %v265_v35 = vand.u32 4294901760, %v264_v27  ;;  %569 = vmatpush.msrb.mxu0 %v263_v21  ;;  %v122_v38 = vand.u32 4294901760, %v841_v32  ;;  %v41_v27 = vld [vmem:[#allocation2 + $0x70] sm:$0xff] }
   0xf   :  { %v115_v36 = vsub.f32 %v828_v23, %v114_v28  ;;  %v187_v42 = vsub.f32 %v824_v22, %v186_v30  ;;  %v862_v48 = vsub.f32 %v53_v41, %v854_v44  ;;  %v56_v49 = vsel %vm45_vm0, %v30_v45, 0 }
  0x10   :  { %v180_v37 = vand.u32 4294901760, %v179_v29  ;;  %742 = vmatpush.msra.mxu3 %v259_v34  ;;  %260 = vmatpush.msra.mxu1 %v259_v34  ;;  %v123_v47 = vsub.f32 %v841_v32, %v122_v38  ;;  %v194_v51 = vand.u32 4294901760, %v852_v43  ;;  %v869_v52 = vand.u32 4294901760, %v80_v46 }
  0x11   :  { %v116_v40 = vand.u32 4294901760, %v115_v36  ;;  %v188_v50 = vand.u32 4294901760, %v187_v42  ;;  %v130_v54 = vand.u32 4294901760, %v862_v48  ;;  %v873_v56 = vand.u32 4294901760, %v56_v49 }
  0x12   :  { %181 = vmatmul.f32.vlgmr.msra.gmra.mxu2 %v180_v37  ;;  %743 = vmatpush.msra.mxu3 %v265_v35  ;;  %v124_v53 = vand.u32 4294901760, %v123_v47  ;;  %v195_v57 = vsub.f32 %v852_v43, %v194_v51  ;;  %v880_v58 = vsub.f32 %v80_v46, %v869_v52  ;;  %v83_v60 = vsel %vm45_vm0, %v39_v55, 0 }
  0x13   :  { %266 = vmatpush.msra.mxu1 %v265_v35  ;;  %300 = vmatmul.f32.vlgmr.msra.gmra.mxu3 %v805_v9  ;;  %v131_v61 = vsub.f32 %v862_v48, %v130_v54  ;;  %v888_v62 = vsub.f32 %v56_v49, %v873_v56  ;;  %v59_v63 = vsel %vm45_vm0, %v31_v59, 0  ;;  %v893_v2 = vand.u32 4294901760, %v83_v60  ;;  %v33_v35 = vld [vmem:[#allocation2 + $0x30] sm:$0xff]  ;;  %v42_v49 = vld [vmem:[#allocation2 + $0x78] sm:$0xff] }
  0x14   :  { %117 = vmatmul.f32.vlgmr.msra.gmra.mxu0 %v116_v40  ;;  %448 = vmatpush.msrb.mxu3 %v800_v3  ;;  %v196_v0 = vand.u32 4294901760, %v195_v57  ;;  %v202_v1 = vand.u32 4294901760, %v880_v58  ;;  %v896_v6 = vand.u32 4294901760, %v59_v63  ;;  %v86_v11 = vsel %vm45_vm0, %v40_v5, 0  ;;  %v34_v57 = vld [vmem:[#allocation2 + $0x38] sm:$0xff] }
  0x15   :  { %268 = vmatmul.f32.vlgmr.msra.gmra.mxu1 %v815_v16  ;;  %v902_v8 = vsub.f32 %v83_v60, %v893_v2  ;;  %v62_v14 = vsel %vm45_vm0, %v32_v10, 0  ;;  %v915_v20 = vand.u32 4294901760, %v86_v11  ;;  %v89_v36 = vsel %vm45_vm0, %v41_v27, 0 }
  0x16   :  { %650 = vmatpush.msrb.mxu1 %v800_v3  ;;  %450 = vmatpush.msrb.mxu3 %v802_v4  ;;  %v132_v3 = vand.u32 4294901760, %v131_v61  ;;  %v203_v7 = vsub.f32 %v880_v58, %v202_v1  ;;  %v910_v13 = vsub.f32 %v59_v63, %v896_v6  ;;  %v918_v29 = vand.u32 4294901760, %v62_v14 }
  0x17   :  { %v210_v19 = vand.u32 4294901760, %v902_v8  ;;  %v924_v34 = vsub.f32 %v86_v11, %v915_v20  ;;  %v65_v40 = vsel %vm45_vm0, %v33_v35, 0  ;;  %v937_v45 = vand.u32 4294901760, %v89_v36 }
  0x18   :  { %652 = vmatpush.msrb.mxu1 %v802_v4  ;;  %v138_v4 = vand.u32 4294901760, %v888_v62  ;;  %v204_v18 = vand.u32 4294901760, %v203_v7  ;;  %v146_v26 = vand.u32 4294901760, %v910_v13  ;;  %v932_v39 = vsub.f32 %v62_v14, %v918_v29 }
  0x19   :  { %v211_v33 = vsub.f32 %v902_v8, %v210_v19  ;;  %v218_v42 = vand.u32 4294901760, %v924_v34  ;;  %v946_v55 = vsub.f32 %v89_v36, %v937_v45  ;;  %v92_v59 = vsel %vm45_vm0, %v42_v49, 0 }
  0x1a   :  { %189 = vmatmul.f32.gmra.mxu2 %v188_v50  ;;  %v139_v12 = vsub.f32 %v888_v62, %v138_v4  ;;  %v147_v37 = vsub.f32 %v910_v13, %v146_v26  ;;  %v154_v47 = vand.u32 4294901760, %v932_v39  ;;  %v940_v50 = vand.u32 4294901760, %v65_v40 }
  0x1b   :  { %304 = vmatmul.f32.gmra.mxu3 %v813_v15  ;;  %v212_v41 = vand.u32 4294901760, %v211_v33  ;;  %v68_v63 = vsel %vm45_vm0, %v34_v57, 0  ;;  %v957_v5 = vand.u32 4294901760, %v92_v59 }
  0x1c   :  { %125 = vmatmul.f32.gmra.mxu0 %v124_v53  ;;  %v140_v21 = vand.u32 4294901760, %v139_v12  ;;  %v148_v46 = vand.u32 4294901760, %v147_v37  ;;  %v219_v53 = vsub.f32 %v924_v34, %v218_v42  ;;  %v155_v60 = vsub.f32 %v932_v39, %v154_v47 }
  0x1d   :  { %272 = vmatmul.f32.gmra.mxu1 %v831_v25  ;;  %v161_v61 = vsub.f32 %v65_v40, %v940_v50  ;;  %v168_v11 = vand.u32 4294901760, %v68_v63  ;;  %v963_v14 = vsub.f32 %v92_v59, %v957_v5 }
  0x1e   :  { %v156_v7 = vand.u32 4294901760, %v155_v60 }
  0x1f   :  { %v162_v10 = vand.u32 4294901760, %v161_v61  ;;  %v234_v33 = vand.u32 4294901760, %v963_v14 }
  0x21   :  { %v235_v37 = vsub.f32 %v963_v14, %v234_v33 }
  0x22   :  { %197 = vmatmul.f32.gmra.mxu2 %v196_v0  ;;  %v220_v0 = vand.u32 4294901760, %v219_v53 }
  0x23   :  { %308 = vmatmul.f32.gmra.mxu3 %v838_v31 }
  0x24   :  { %133 = vmatmul.f32.gmra.mxu0 %v132_v3  ;;  %v226_v3 = vand.u32 4294901760, %v946_v55 }
  0x25   :  { %276 = vmatmul.f32.gmra.mxu1 %v854_v44 }
  0x26   :  { %v227_v12 = vsub.f32 %v946_v55, %v226_v3 }
  0x28   :  { %v228_v27 = vand.u32 4294901760, %v227_v12 }
  0x2a   :  { %205 = vmatmul.f32.gmra.mxu2 %v204_v18  ;;  %v163_v18 = vsub.f32 %v161_v61, %v162_v10 }
  0x2b   :  { %312 = vmatmul.f32.gmra.mxu3 %v869_v52 }
  0x2c   :  { %141 = vmatmul.f32.gmra.mxu0 %v140_v21  ;;  %v169_v21 = vsub.f32 %v68_v63, %v168_v11  ;;  %v164_v35 = vand.u32 4294901760, %v163_v18 }
  0x2d   :  { %280 = vmatmul.f32.gmra.mxu1 %v873_v56 }
  0x2e   :  { %v170_v36 = vand.u32 4294901760, %v169_v21 }
  0x30   :  { %v171_v40 = vsub.f32 %v169_v21, %v170_v36 }
  0x32   :  { %213 = vmatmul.f32.gmra.mxu2 %v212_v41  ;;  %v236_v41 = vand.u32 4294901760, %v235_v37 }
  0x33   :  { %316 = vmatmul.f32.gmra.mxu3 %v893_v2 }
  0x34   :  { %149 = vmatmul.f32.gmra.mxu0 %v148_v46  ;;  %v172_v46 = vand.u32 4294901760, %v171_v40 }
  0x35   :  { %284 = vmatmul.f32.gmra.mxu1 %v896_v6 }
  0x3a   :  { %221 = vmatmul.f32.gmra.mxu2 %v220_v0 }
  0x3b   :  { %320 = vmatmul.f32.gmra.mxu3 %v915_v20 }
  0x3c   :  { %157 = vmatmul.f32.gmra.mxu0 %v156_v7 }
  0x3d   :  { %288 = vmatmul.f32.gmra.mxu1 %v918_v29 }
  0x42   :  { %229 = vmatmul.f32.gmra.mxu2 %v228_v27 }
  0x43   :  { %324 = vmatmul.f32.gmra.mxu3 %v937_v45 }
  0x44   :  { %165 = vmatmul.f32.gmra.mxu0 %v164_v35 }
  0x45   :  { %292 = vmatmul.f32.gmra.mxu1 %v940_v50 }
  0x4a   :  { %237 = vmatmul.f32.gmra.mxu2 %v236_v41 }
  0x4b   :  { %328 = vmatmul.f32.gmra.mxu3 %v957_v5 }
  0x4c   :  { %173 = vmatmul.f32.gmra.mxu0 %v172_v46 }
  0x4d   :  { %296 = vmatmul.f32.gmra.mxu1 %v168_v11 }
  0x52   :  { %354 = vmatmul.f32.vlgmr.msrb.gmra.mxu2 %v828_v23 }
  0x53   :  { %454 = vmatmul.f32.vlgmr.msrb.gmra.mxu3 %v114_v28 }
  0x54   :  { %571 = vmatmul.f32.vlgmr.msrb.gmra.mxu0 %v815_v16 }
  0x55   :  { %654 = vmatmul.f32.vlgmr.msrb.gmra.mxu1 %v815_v16 }
  0x5a   :  { %359 = vmatmul.f32.gmra.mxu2 %v841_v32 }
  0x5b   :  { %460 = vmatmul.f32.gmra.mxu3 %v122_v38 }
  0x5c   :  { %575 = vmatmul.f32.gmra.mxu0 %v831_v25 }
  0x5d   :  { %658 = vmatmul.f32.gmra.mxu1 %v831_v25 }
  0x62   :  { %364 = vmatmul.f32.gmra.mxu2 %v862_v48 }
  0x63   :  { %466 = vmatmul.f32.gmra.mxu3 %v130_v54 }
  0x64   :  { %579 = vmatmul.f32.gmra.mxu0 %v854_v44 }
  0x65   :  { %662 = vmatmul.f32.gmra.mxu1 %v854_v44 }
  0x6a   :  { %369 = vmatmul.f32.gmra.mxu2 %v888_v62 }
  0x6b   :  { %472 = vmatmul.f32.gmra.mxu3 %v138_v4 }
  0x6c   :  { %583 = vmatmul.f32.gmra.mxu0 %v873_v56 }
  0x6d   :  { %666 = vmatmul.f32.gmra.mxu1 %v873_v56 }
  0x72   :  { %374 = vmatmul.f32.gmra.mxu2 %v910_v13 }
  0x73   :  { %478 = vmatmul.f32.gmra.mxu3 %v146_v26 }
  0x74   :  { %587 = vmatmul.f32.gmra.mxu0 %v896_v6 }
  0x75   :  { %670 = vmatmul.f32.gmra.mxu1 %v896_v6 }
  0x7a   :  { %379 = vmatmul.f32.gmra.mxu2 %v932_v39 }
  0x7b   :  { %484 = vmatmul.f32.gmra.mxu3 %v154_v47 }
  0x7c   :  { %591 = vmatmul.f32.gmra.mxu0 %v918_v29 }
  0x7d   :  { %674 = vmatmul.f32.gmra.mxu1 %v918_v29 }
  0x82   :  { %384 = vmatmul.f32.gmra.mxu2 %v161_v61 }
  0x83   :  { %490 = vmatmul.f32.gmra.mxu3 %v162_v10 }
  0x84   :  { %595 = vmatmul.f32.gmra.mxu0 %v940_v50 }
  0x85   :  { %678 = vmatmul.f32.gmra.mxu1 %v940_v50 }
  0x8a   :  { %389 = vmatmul.f32.gmra.mxu2 %v169_v21 }
  0x8b   :  { %496 = vmatmul.f32.gmra.mxu3 %v170_v36 }
  0x8c   :  { %599 = vmatmul.f32.gmra.mxu0 %v168_v11 }
  0x8d   :  { %682 = vmatmul.f32.gmra.mxu1 %v168_v11 }
  0x91   :  { %v1006_v16 = vpop.f32.mrf.mxu0 }
  0x92   :  { %394 = vmatmul.f32.gmra.mxu2 %v818_v17  ;;  %v1009_v23 = vpop.f32.mrf.mxu1 }
  0x93   :  { %502 = vmatmul.f32.gmra.mxu3 %v178_v24  ;;  %v270_v59 = vadd.f32 %v1009_v23, %v1006_v16 }
  0x94   :  { %603 = vmatmul.f32.gmra.mxu0 %v805_v9 }
  0x95   :  { %v182_v25 = vpop.f32.mrf.mxu2  ;;  %686 = vmatmul.f32.gmra.mxu1 %v805_v9 }
  0x96   :  { %v301_v28 = vpop.f32.mrf.mxu3 }
  0x97   :  { %v1015_v32 = vadd.f32 %v301_v28, %v182_v25 }
  0x99   :  { %v1017_v38 = vpop.f32.mrf.mxu0 }
  0x9a   :  { %399 = vmatmul.f32.gmra.mxu2 %v824_v22  ;;  %v1020_v44 = vpop.f32.mrf.mxu1 }
  0x9b   :  { %508 = vmatmul.f32.gmra.mxu3 %v186_v30  ;;  %v274_v11 = vadd.f32 %v1020_v44, %v1017_v38 }
  0x9c   :  { %607 = vmatmul.f32.gmra.mxu0 %v813_v15 }
  0x9d   :  { %v190_v17 = vpop.f32.mrf.mxu2  ;;  %690 = vmatmul.f32.gmra.mxu1 %v813_v15 }
  0x9e   :  { %v305_v24 = vpop.f32.mrf.mxu3 }
  0x9f   :  { %v1026_v48 = vadd.f32 %v305_v24, %v190_v17 }
  0xa1   :  { %v1028_v9 = vpop.f32.mrf.mxu0 }
  0xa2   :  { %404 = vmatmul.f32.gmra.mxu2 %v852_v43  ;;  %v1031_v54 = vpop.f32.mrf.mxu1 }
  0xa3   :  { %514 = vmatmul.f32.gmra.mxu3 %v194_v51  ;;  %v278_v36 = vadd.f32 %v1031_v54, %v1028_v9 }
  0xa4   :  { %611 = vmatmul.f32.gmra.mxu0 %v838_v31 }
  0xa5   :  { %v198_v22 = vpop.f32.mrf.mxu2  ;;  %694 = vmatmul.f32.gmra.mxu1 %v838_v31 }
  0xa6   :  { %v309_v30 = vpop.f32.mrf.mxu3 }
  0xa7   :  { %v1037_v56 = vadd.f32 %v309_v30, %v198_v22 }
  0xa9   :  { %v1039_v15 = vpop.f32.mrf.mxu0 }
  0xaa   :  { %409 = vmatmul.f32.gmra.mxu2 %v880_v58  ;;  %v1042_v62 = vpop.f32.mrf.mxu1 }
  0xab   :  { %520 = vmatmul.f32.gmra.mxu3 %v202_v1  ;;  %v282_v38 = vadd.f32 %v1042_v62, %v1039_v15 }
  0xac   :  { %615 = vmatmul.f32.gmra.mxu0 %v869_v52 }
  0xad   :  { %v206_v43 = vpop.f32.mrf.mxu2  ;;  %698 = vmatmul.f32.gmra.mxu1 %v869_v52 }
  0xae   :  { %v313_v51 = vpop.f32.mrf.mxu3 }
  0xaf   :  { %v1048_v4 = vadd.f32 %v313_v51, %v206_v43 }
  0xb1   :  { %v1050_v31 = vpop.f32.mrf.mxu0 }
  0xb2   :  { %414 = vmatmul.f32.gmra.mxu2 %v902_v8  ;;  %v1053_v6 = vpop.f32.mrf.mxu1 }
  0xb3   :  { %526 = vmatmul.f32.gmra.mxu3 %v210_v19  ;;  %v286_v51 = vadd.f32 %v1053_v6, %v1050_v31 }
  0xb4   :  { %619 = vmatmul.f32.gmra.mxu0 %v893_v2 }
  0xb5   :  { %v214_v58 = vpop.f32.mrf.mxu2  ;;  %702 = vmatmul.f32.gmra.mxu1 %v893_v2 }
  0xb6   :  { %v317_v1 = vpop.f32.mrf.mxu3 }
  0xb7   :  { %v1059_v13 = vadd.f32 %v317_v1, %v214_v58 }
  0xb9   :  { %v1061_v52 = vpop.f32.mrf.mxu0 }
  0xba   :  { %419 = vmatmul.f32.gmra.mxu2 %v924_v34  ;;  %v1064_v26 = vpop.f32.mrf.mxu1 }
  0xbb   :  { %532 = vmatmul.f32.gmra.mxu3 %v218_v42 }
  0xbc   :  { %623 = vmatmul.f32.gmra.mxu0 %v915_v20 }
  0xbd   :  { %v222_v8 = vpop.f32.mrf.mxu2  ;;  %706 = vmatmul.f32.gmra.mxu1 %v915_v20 }
  0xbe   :  { %v321_v19 = vpop.f32.mrf.mxu3 }
  0xbf   :  { %v1070_v29 = vadd.f32 %v321_v19, %v222_v8 }
  0xc1   :  { %v1072_v2 = vpop.f32.mrf.mxu0 }
  0xc2   :  { %424 = vmatmul.f32.gmra.mxu2 %v946_v55  ;;  %v1075_v39 = vpop.f32.mrf.mxu1 }
  0xc3   :  { %538 = vmatmul.f32.gmra.mxu3 %v226_v3 }
  0xc4   :  { %627 = vmatmul.f32.gmra.mxu0 %v937_v45 }
  0xc5   :  { %v230_v34 = vpop.f32.mrf.mxu2  ;;  %710 = vmatmul.f32.gmra.mxu1 %v937_v45 }
  0xc6   :  { %v325_v42 = vpop.f32.mrf.mxu3 }
  0xc7   :  { %v1081_v47 = vadd.f32 %v325_v42, %v230_v34 }
  0xc9   :  { %v1083_v20 = vpop.f32.mrf.mxu0 }
  0xca   :  { %429 = vmatmul.f32.gmra.mxu2 %v963_v14  ;;  %v1086_v49 = vpop.f32.mrf.mxu1 }
  0xcb   :  { %544 = vmatmul.f32.gmra.mxu3 %v234_v33 }
  0xcc   :  { %631 = vmatmul.f32.gmra.mxu0 %v957_v5 }
  0xcd   :  { %v238_v50 = vpop.f32.mrf.mxu2  ;;  %714 = vmatmul.f32.gmra.mxu1 %v957_v5 }
  0xce   :  { %v329_v53 = vpop.f32.mrf.mxu3 }
  0xcf   :  { %v1092_v55 = vadd.f32 %v329_v53, %v238_v50  ;;  %v290_v50 = vadd.f32 %v1064_v26, %v1061_v52 }
  0xd1   :  { %v572_v45 = vpop.f32.mrf.mxu0 }
  0xd2   :  { %v655_v57 = vpop.f32.mrf.mxu1 }
  0xd5   :  { %v355_v60 = vpop.f32.mrf.mxu2 }
  0xd6   :  { %v356_v61 = vadd.f32 %v355_v60, %v270_v59  ;;  %v455_v63 = vpop.f32.mrf.mxu3 }
  0xd8   :  { %v456_v0 = vadd.f32 %v455_v63, %v356_v61  ;;  %v294_v63 = vadd.f32 %v1075_v39, %v1072_v2 }
  0xd9   :  { %v576_v3 = vpop.f32.mrf.mxu0 }
  0xda   :  { %v573_v7 = vadd.f32 %v572_v45, %v456_v0  ;;  %v659_v10 = vpop.f32.mrf.mxu1 }
  0xdc   :  { %v656_v5 = vadd.f32 %v655_v57, %v573_v7 }
  0xdd   :  { %v360_v12 = vpop.f32.mrf.mxu2 }
  0xde   :  { %719 = vst.msk [vmem:[%s1184_s2] sm:$0xff] %vm718_vm1, %v656_v5  ;;  %v361_v14 = vadd.f32 %v360_v12, %v274_v11  ;;  %v461_v18 = vpop.f32.mrf.mxu3  ;;  %v298_v12 = vadd.f32 %v1086_v49, %v1083_v20 }
  0xe0   :  { %v462_v21 = vadd.f32 %v461_v18, %v361_v14 }
  0xe1   :  { %v580_v27 = vpop.f32.mrf.mxu0 }
  0xe2   :  { %v577_v33 = vadd.f32 %v576_v3, %v462_v21  ;;  %v663_v35 = vpop.f32.mrf.mxu1 }
  0xe4   :  { %v660_v37 = vadd.f32 %v659_v10, %v577_v33 }
  0xe5   :  { %v365_v40 = vpop.f32.mrf.mxu2 }
  0xe6   :  { %720 = vst.msk [vmem:[%s1184_s2 + $0x8] sm:$0xff] %vm718_vm1, %v660_v37  ;;  %v366_v41 = vadd.f32 %v365_v40, %v278_v36  ;;  %v467_v46 = vpop.f32.mrf.mxu3 }
  0xe8   :  { %v468_v16 = vadd.f32 %v467_v46, %v366_v41 }
  0xe9   :  { %v584_v23 = vpop.f32.mrf.mxu0 }
  0xea   :  { %v581_v25 = vadd.f32 %v580_v27, %v468_v16  ;;  %v667_v28 = vpop.f32.mrf.mxu1 }
  0xec   :  { %v664_v44 = vadd.f32 %v663_v35, %v581_v25 }
  0xed   :  { %v370_v17 = vpop.f32.mrf.mxu2 }
  0xee   :  { %721 = vst.msk [vmem:[%s1184_s2 + $0x10] sm:$0xff] %vm718_vm1, %v664_v44  ;;  %v371_v24 = vadd.f32 %v370_v17, %v282_v38  ;;  %v473_v9 = vpop.f32.mrf.mxu3 }
  0xf0   :  { %v474_v54 = vadd.f32 %v473_v9, %v371_v24 }
  0xf1   :  { %v588_v22 = vpop.f32.mrf.mxu0 }
  0xf2   :  { %v585_v30 = vadd.f32 %v584_v23, %v474_v54  ;;  %v671_v43 = vpop.f32.mrf.mxu1 }
  0xf4   :  { %v668_v58 = vadd.f32 %v667_v28, %v585_v30 }
  0xf5   :  { %v375_v1 = vpop.f32.mrf.mxu2 }
  0xf6   :  { %722 = vst.msk [vmem:[%s1184_s2 + $0x18] sm:$0xff] %vm718_vm1, %v668_v58  ;;  %v376_v15 = vadd.f32 %v375_v1, %v286_v51  ;;  %v479_v62 = vpop.f32.mrf.mxu3 }
  0xf8   :  { %v480_v8 = vadd.f32 %v479_v62, %v376_v15 }
  0xf9   :  { %v592_v19 = vpop.f32.mrf.mxu0 }
  0xfa   :  { %v589_v34 = vadd.f32 %v588_v22, %v480_v8  ;;  %v675_v42 = vpop.f32.mrf.mxu1 }
  0xfc   :  { %v672_v53 = vadd.f32 %v671_v43, %v589_v34 }
  0xfd   :  { %v380_v45 = vpop.f32.mrf.mxu2 }
  0xfe   :  { %723 = vst.msk [vmem:[%s1184_s2 + $0x20] sm:$0xff] %vm718_vm1, %v672_v53  ;;  %v381_v31 = vadd.f32 %v380_v45, %v290_v50  ;;  %v485_v6 = vpop.f32.mrf.mxu3 }
 0x100   :  { %v486_v57 = vadd.f32 %v485_v6, %v381_v31 }
 0x101   :  { %v596_v59 = vpop.f32.mrf.mxu0 }
 0x102   :  { %v593_v60 = vadd.f32 %v592_v19, %v486_v57  ;;  %v679_v61 = vpop.f32.mrf.mxu1 }
 0x104   :  { %v676_v0 = vadd.f32 %v675_v42, %v593_v60 }
 0x105   :  { %v385_v3 = vpop.f32.mrf.mxu2 }
 0x106   :  { %724 = vst.msk [vmem:[%s1184_s2 + $0x28] sm:$0xff] %vm718_vm1, %v676_v0  ;;  %v386_v52 = vadd.f32 %v385_v3, %v294_v63  ;;  %v491_v26 = vpop.f32.mrf.mxu3 }
 0x108   :  { %v492_v7 = vadd.f32 %v491_v26, %v386_v52 }
 0x109   :  { %v600_v10 = vpop.f32.mrf.mxu0 }
 0x10a   :  { %v597_v11 = vadd.f32 %v596_v59, %v492_v7  ;;  %v683_v5 = vpop.f32.mrf.mxu1 }
 0x10c   :  { %v680_v14 = vadd.f32 %v679_v61, %v597_v11 }
 0x10d   :  { %v390_v18 = vpop.f32.mrf.mxu2 }
 0x10e   :  { %725 = vst.msk [vmem:[%s1184_s2 + $0x30] sm:$0xff] %vm718_vm1, %v680_v14  ;;  %v391_v2 = vadd.f32 %v390_v18, %v298_v12  ;;  %v497_v39 = vpop.f32.mrf.mxu3 }
 0x110   :  { %v498_v21 = vadd.f32 %v497_v39, %v391_v2 }
 0x111   :  { %v604_v27 = vpop.f32.mrf.mxu0 }
 0x112   :  { %v601_v33 = vadd.f32 %v600_v10, %v498_v21  ;;  %v687_v35 = vpop.f32.mrf.mxu1 }
 0x114   :  { %v684_v36 = vadd.f32 %v683_v5, %v601_v33 }
 0x115   :  { %v395_v37 = vpop.f32.mrf.mxu2 }
 0x116   :  { %726 = vst.msk [vmem:[%s1184_s2 + $0x38] sm:$0xff] %vm718_vm1, %v684_v36  ;;  %v396_v20 = vadd.f32 %v395_v37, %v1015_v32  ;;  %v503_v49 = vpop.f32.mrf.mxu3 }
 0x118   :  { %v504_v40 = vadd.f32 %v503_v49, %v396_v20 }
 0x119   :  { %v608_v41 = vpop.f32.mrf.mxu0 }
 0x11a   :  { %v605_v46 = vadd.f32 %v604_v27, %v504_v40  ;;  %v691_v16 = vpop.f32.mrf.mxu1 }
 0x11c   :  { %v688_v23 = vadd.f32 %v687_v35, %v605_v46 }
 0x11d   :  { %v400_v25 = vpop.f32.mrf.mxu2 }
 0x11e   :  { %727 = vst.msk [vmem:[%s1184_s2 + $0x40] sm:$0xff] %vm718_vm1, %v688_v23  ;;  %v401_v28 = vadd.f32 %v400_v25, %v1026_v48  ;;  %v509_v38 = vpop.f32.mrf.mxu3 }
 0x120   :  { %v510_v44 = vadd.f32 %v509_v38, %v401_v28 }
 0x121   :  { %v612_v17 = vpop.f32.mrf.mxu0 }
 0x122   :  { %v609_v24 = vadd.f32 %v608_v41, %v510_v44  ;;  %v695_v9 = vpop.f32.mrf.mxu1 }
 0x124   :  { %v692_v32 = vadd.f32 %v691_v16, %v609_v24 }
 0x125   :  { %v405_v54 = vpop.f32.mrf.mxu2 }
 0x126   :  { %728 = vst.msk [vmem:[%s1184_s2 + $0x48] sm:$0xff] %vm718_vm1, %v692_v32  ;;  %v406_v22 = vadd.f32 %v405_v54, %v1037_v56  ;;  %v515_v30 = vpop.f32.mrf.mxu3 }
 0x128   :  { %v516_v43 = vadd.f32 %v515_v30, %v406_v22 }
 0x129   :  { %v616_v51 = vpop.f32.mrf.mxu0 }
 0x12a   :  { %v613_v58 = vadd.f32 %v612_v17, %v516_v43  ;;  %v699_v1 = vpop.f32.mrf.mxu1 }
 0x12c   :  { %v696_v48 = vadd.f32 %v695_v9, %v613_v58 }
 0x12d   :  { %v410_v15 = vpop.f32.mrf.mxu2 }
 0x12e   :  { %729 = vst.msk [vmem:[%s1184_s2 + $0x50] sm:$0xff] %vm718_vm1, %v696_v48  ;;  %v411_v62 = vadd.f32 %v410_v15, %v1048_v4  ;;  %v521_v8 = vpop.f32.mrf.mxu3 }
 0x130   :  { %v522_v19 = vadd.f32 %v521_v8, %v411_v62 }
 0x131   :  { %v620_v34 = vpop.f32.mrf.mxu0 }
 0x132   :  { %v617_v42 = vadd.f32 %v616_v51, %v522_v19  ;;  %v703_v50 = vpop.f32.mrf.mxu1 }
 0x134   :  { %v700_v56 = vadd.f32 %v699_v1, %v617_v42 }
 0x135   :  { %v415_v53 = vpop.f32.mrf.mxu2 }
 0x136   :  { %730 = vst.msk [vmem:[%s1184_s2 + $0x58] sm:$0xff] %vm718_vm1, %v700_v56  ;;  %v416_v45 = vadd.f32 %v415_v53, %v1059_v13  ;;  %v527_v31 = vpop.f32.mrf.mxu3 }
 0x138   :  { %v528_v6 = vadd.f32 %v527_v31, %v416_v45 }
 0x139   :  { %v624_v59 = vpop.f32.mrf.mxu0 }
 0x13a   :  { %v621_v57 = vadd.f32 %v620_v34, %v528_v6  ;;  %v707_v61 = vpop.f32.mrf.mxu1 }
 0x13c   :  { %v704_v60 = vadd.f32 %v703_v50, %v621_v57 }
 0x13d   :  { %v420_v4 = vpop.f32.mrf.mxu2 }
 0x13e   :  { %731 = vst.msk [vmem:[%s1184_s2 + $0x60] sm:$0xff] %vm718_vm1, %v704_v60  ;;  %v421_v63 = vadd.f32 %v420_v4, %v1070_v29  ;;  %v533_v0 = vpop.f32.mrf.mxu3 }
 0x140   :  { %v534_v3 = vadd.f32 %v533_v0, %v421_v63 }
 0x141   :  { %v628_v13 = vpop.f32.mrf.mxu0 }
 0x142   :  { %v625_v52 = vadd.f32 %v624_v59, %v534_v3  ;;  %v711_v5 = vpop.f32.mrf.mxu1 }
 0x144   :  { %v708_v26 = vadd.f32 %v707_v61, %v625_v52 }
 0x145   :  { %v425_v7 = vpop.f32.mrf.mxu2 }
 0x146   :  { %732 = vst.msk [vmem:[%s1184_s2 + $0x68] sm:$0xff] %vm718_vm1, %v708_v26  ;;  %v426_v10 = vadd.f32 %v425_v7, %v1081_v47  ;;  %v539_v11 = vpop.f32.mrf.mxu3 }
 0x148   :  { %v540_v12 = vadd.f32 %v539_v11, %v426_v10 }
 0x149   :  { %v632_v21 = vpop.f32.mrf.mxu0 }
 0x14a   :  { %v629_v14 = vadd.f32 %v628_v13, %v540_v12  ;;  %v715_v33 = vpop.f32.mrf.mxu1 }
 0x14c   :  { %v712_v18 = vadd.f32 %v711_v5, %v629_v14 }
 0x14d   :  { %v430_v2 = vpop.f32.mrf.mxu2 }
 0x14e   :  { %733 = vst.msk [vmem:[%s1184_s2 + $0x70] sm:$0xff] %vm718_vm1, %v712_v18  ;;  %v431_v29 = vadd.f32 %v430_v2, %v1092_v55  ;;  %v545_v39 = vpop.f32.mrf.mxu3 }
 0x150   :  { %v546_v27 = vadd.f32 %v545_v39, %v431_v29 }
 0x152   :  { %v633_v35 = vadd.f32 %v632_v21, %v546_v27 }
 0x154   :  { %v716_v36 = vadd.f32 %v715_v33, %v633_v35 }
 0x156   :  { %734 = vst.msk [vmem:[%s1184_s2 + $0x78] sm:$0xff] %vm718_vm1, %v716_v36 }
 0x157   :  { %739 = vsyncpa [#allocation3], 1 }

</bundles_post_ra>
